<compile_context>
chip_gen: v7x
topology: tpu7x:2x2x1
jax: 0.10.0
libtpu: 0.0.40
codegen_flags: <defaults>
</compile_context>

<pallas_src>
import jax
import jax.numpy as jnp
from jax.experimental import pallas as pl
from jax.experimental.pallas import tpu as pltpu

HIDDEN = 128          # hidden width of the MLP (already lane-dense)
LANE = 128            # TPU lane width
SUBLANE_BF16 = 16     # bf16 sublane packing (rows per vreg)
MAX_TILE_B = 1024     # cap on batch-tile rows (x:256KiB bf16, out:512KiB f32 -> trivially fits VMEM)


def _round_up(n, m):
    return ((n + m - 1) // m) * m


def _lander_mlp_kernel(x_ref, w1_ref, b1_ref, w2_ref, b2_ref, w3_ref, b3_ref,
                       out_ref):
    """Fused 3-layer MLP on one batch tile.

    x:  (tile_B, in_pad)   bf16  (zero-padded input features)
    w1: (in_pad, 128)      bf16
    w2: (128, 128)         bf16
    w3: (128, out_pad)     bf16  (zero-padded action columns)
    b*: (1, width)         f32
    out:(tile_B, out_pad)  f32   (padded logits; real logits live in [:, :n_actions])
    """
    x = x_ref[...]

    # Layer 1: Linear + ReLU. bf16 MXU matmul with f32 accumulation; bias-add
    # and ReLU run in f32 on the VPU.
    h1 = jnp.dot(x, w1_ref[...], preferred_element_type=jnp.float32)
    h1 = jnp.maximum(h1 + b1_ref[...], 0.0)

    # Layer 2: Linear + ReLU.
    h2 = jnp.dot(h1.astype(jnp.bfloat16), w2_ref[...],
                 preferred_element_type=jnp.float32)
    h2 = jnp.maximum(h2 + b2_ref[...], 0.0)

    # Layer 3: Linear (logits). Lane-dense output slab; padded action columns
    # are exact zeros because W3/b3 were zero-padded.
    logits = jnp.dot(h2.astype(jnp.bfloat16), w3_ref[...],
                     preferred_element_type=jnp.float32)
    out_ref[...] = (logits + b3_ref[...]).astype(out_ref.dtype)


@jax.jit
def lander_forward(x, w1, b1, w2, b2, w3, b3):
    """LanderNN forward: logits = relu(relu(x@W1+b1)@W2+b2)@W3+b3.

    x:  (B, input_dim) f32
    w1: (input_dim, 128), w2: (128, 128), w3: (128, n_actions)   -- f32 params
    b1: (128,), b2: (128,), b3: (n_actions,)                     -- f32 params
    Returns (B, n_actions) f32 logits.
    """
    batch, in_dim = x.shape
    n_actions = w3.shape[1]

    # ---- Pad to lane-dense / sublane-aligned shapes; cast weights to bf16.
    in_pad = _round_up(in_dim, LANE)
    out_pad = _round_up(n_actions, LANE)
    batch16 = _round_up(batch, SUBLANE_BF16)
    tile_b = min(MAX_TILE_B, batch16)
    batch_pad = _round_up(batch16, tile_b)
    grid_b = batch_pad // tile_b

    xp = jnp.pad(x.astype(jnp.bfloat16),
                 ((0, batch_pad - batch), (0, in_pad - in_dim)))

    w1p = jnp.pad(w1.astype(jnp.bfloat16), ((0, in_pad - in_dim), (0, 0)))
    w2p = w2.astype(jnp.bfloat16)
    w3p = jnp.pad(w3.astype(jnp.bfloat16), ((0, 0), (0, out_pad - n_actions)))

    b1p = b1.reshape(1, HIDDEN).astype(jnp.float32)
    b2p = b2.reshape(1, HIDDEN).astype(jnp.float32)
    b3p = jnp.pad(b3.reshape(1, n_actions).astype(jnp.float32),
                  ((0, 0), (0, out_pad - n_actions)))

    # ---- Cost hint so XLA can overlap this small custom call with neighbors.
    flops = 2 * batch_pad * (in_pad * HIDDEN + HIDDEN * HIDDEN + HIDDEN * out_pad)
    bytes_accessed = (
        batch_pad * in_pad * 2                                          # x (bf16)
        + (in_pad * HIDDEN + HIDDEN * HIDDEN + HIDDEN * out_pad) * 2    # weights (bf16)
        + (2 * HIDDEN + out_pad) * 4                                    # biases (f32)
        + batch_pad * out_pad * 4)                                      # output (f32)

    out = pl.pallas_call(
        _lander_mlp_kernel,
        out_shape=jax.ShapeDtypeStruct((batch_pad, out_pad), jnp.float32),
        grid_spec=pltpu.PrefetchScalarGridSpec(
            num_scalar_prefetch=0,
            grid=(grid_b,),
            in_specs=[
                pl.BlockSpec((tile_b, in_pad), lambda i: (i, 0)),   # x tile
                pl.BlockSpec((in_pad, HIDDEN), lambda i: (0, 0)),   # W1 resident
                pl.BlockSpec((1, HIDDEN), lambda i: (0, 0)),        # b1 resident
                pl.BlockSpec((HIDDEN, HIDDEN), lambda i: (0, 0)),   # W2 resident
                pl.BlockSpec((1, HIDDEN), lambda i: (0, 0)),        # b2 resident
                pl.BlockSpec((HIDDEN, out_pad), lambda i: (0, 0)),  # W3 resident
                pl.BlockSpec((1, out_pad), lambda i: (0, 0)),       # b3 resident
            ],
            out_specs=pl.BlockSpec((tile_b, out_pad), lambda i: (i, 0)),
        ),
        compiler_params=pltpu.CompilerParams(
            dimension_semantics=("parallel",)),
        cost_estimate=pl.CostEstimate(
            flops=flops, transcendentals=0, bytes_accessed=bytes_accessed),
    )(xp, w1p, b1p, w2p, b2p, w3p, b3p)

    return out[:batch, :n_actions]


def init_params(key, input_dim, n_actions, hidden=HIDDEN):
    """Deterministic PyTorch-style init: U(-1/sqrt(fan_in), 1/sqrt(fan_in))."""
    ks = jax.random.split(key, 6)

    def lin(kw, kb, fan_in, fan_out):
        bound = 1.0 / jnp.sqrt(jnp.float32(fan_in))
        w = jax.random.uniform(kw, (fan_in, fan_out), jnp.float32, -bound, bound)
        b = jax.random.uniform(kb, (fan_out,), jnp.float32, -bound, bound)
        return w, b

    w1, b1 = lin(ks[0], ks[1], input_dim, hidden)
    w2, b2 = lin(ks[2], ks[3], hidden, hidden)
    w3, b3 = lin(ks[4], ks[5], hidden, n_actions)
    return w1, b1, w2, b2, w3, b3


if __name__ == "__main__":
    # TODO(synk): the Adam optimizer / training state of LanderNN is not part of
    # the forward pass and is not implemented here.
    key = jax.random.PRNGKey(0)
    k_x, k_p = jax.random.split(key)

    input_dim = 8      # Lunar Lander observation size
    n_actions = 4      # Lunar Lander action count
    batch = 8

    x = jax.random.normal(k_x, (batch, input_dim), jnp.float32)
    params = init_params(k_p, input_dim, n_actions)

    logits = lander_forward(x, *params)
    jax.block_until_ready(logits)
    assert logits.shape == (batch, n_actions)

    # Reference in plain JAX mirroring the kernel's bf16-weight / f32-accumulate
    # numerics (checks the kernel itself, independent of quantization error).
    w1, b1, w2, b2, w3, b3 = params
    xb = x.astype(jnp.bfloat16)
    h = jnp.dot(xb, w1.astype(jnp.bfloat16),
                preferred_element_type=jnp.float32) + b1
    h = jnp.maximum(h, 0.0)
    h = jnp.dot(h.astype(jnp.bfloat16), w2.astype(jnp.bfloat16),
                preferred_element_type=jnp.float32) + b2
    h = jnp.maximum(h, 0.0)
    ref = jnp.dot(h.astype(jnp.bfloat16), w3.astype(jnp.bfloat16),
                  preferred_element_type=jnp.float32) + b3
    assert jnp.allclose(logits, ref, atol=1e-2, rtol=1e-2), (
        "max abs err %g" % float(jnp.max(jnp.abs(logits - ref))))

    # Loose sanity check against the full-f32 math (bf16 quantization error only).
    ref32 = jnp.maximum(x @ w1 + b1, 0.0)
    ref32 = jnp.maximum(ref32 @ w2 + b2, 0.0)
    ref32 = ref32 @ w3 + b3
    assert jnp.allclose(logits, ref32, atol=5e-2, rtol=5e-2)

    print("KERNEL_OK")
</pallas_src>

<mosaic_0001>
module attributes {stable_mosaic.version = 11 : i64} {
  func.func @_lander_mlp_kernel(%arg0: i32, %arg1: memref<16x128xbf16, #tpu.memory_space<vmem>>, %arg2: memref<128x128xbf16, #tpu.memory_space<vmem>>, %arg3: memref<1x128xf32, #tpu.memory_space<vmem>>, %arg4: memref<128x128xbf16, #tpu.memory_space<vmem>>, %arg5: memref<1x128xf32, #tpu.memory_space<vmem>>, %arg6: memref<128x128xbf16, #tpu.memory_space<vmem>>, %arg7: memref<1x128xf32, #tpu.memory_space<vmem>>, %arg8: memref<16x128xf32, #tpu.memory_space<vmem>>) attributes {dimension_semantics = [#tpu.dimension_semantics<parallel>], iteration_bounds = array<i64: 1>, scalar_prefetch = 0 : i64, scratch_operands = 0 : i64, tpu.core_type = #tpu.core_type<tc>, window_params = [{transform_indices = @transform_0, window_bounds = array<i64: 16, 128>}, {pipeline_mode = #tpu.pipeline_mode<synchronous>, transform_indices = @transform_1, window_bounds = array<i64: 128, 128>}, {pipeline_mode = #tpu.pipeline_mode<synchronous>, transform_indices = @transform_2, window_bounds = array<i64: 1, 128>}, {pipeline_mode = #tpu.pipeline_mode<synchronous>, transform_indices = @transform_3, window_bounds = array<i64: 128, 128>}, {pipeline_mode = #tpu.pipeline_mode<synchronous>, transform_indices = @transform_4, window_bounds = array<i64: 1, 128>}, {pipeline_mode = #tpu.pipeline_mode<synchronous>, transform_indices = @transform_5, window_bounds = array<i64: 128, 128>}, {pipeline_mode = #tpu.pipeline_mode<synchronous>, transform_indices = @transform_6, window_bounds = array<i64: 1, 128>}, {transform_indices = @transform_7, window_bounds = array<i64: 16, 128>}]} {
    %c0 = arith.constant 0 : index
    %c0_0 = arith.constant 0 : index
    %0 = vector.load %arg1[%c0, %c0_0] : memref<16x128xbf16, #tpu.memory_space<vmem>>, vector<16x128xbf16>
    %c0_1 = arith.constant 0 : index
    %c0_2 = arith.constant 0 : index
    %1 = vector.load %arg2[%c0_1, %c0_2] : memref<128x128xbf16, #tpu.memory_space<vmem>>, vector<128x128xbf16>
    %cst = arith.constant dense<0.000000e+00> : vector<16x128xf32>
    %2 = tpu.matmul %0, %1, %cst {dimension_numbers = #tpu.dot_dimension_numbers<[1], [0], [0], [1], [0, 0, 1, 1], [], []>} : vector<16x128xbf16>, vector<128x128xbf16>, vector<16x128xf32> -> vector<16x128xf32>
    %c0_3 = arith.constant 0 : index
    %c0_4 = arith.constant 0 : index
    %3 = vector.load %arg3[%c0_3, %c0_4] : memref<1x128xf32, #tpu.memory_space<vmem>>, vector<1x128xf32>
    %4 = vector.broadcast %3 : vector<1x128xf32> to vector<16x128xf32>
    %5 = arith.addf %2, %4 : vector<16x128xf32>
    %cst_5 = arith.constant 0.000000e+00 : f32
    %6 = vector.broadcast %cst_5 : f32 to vector<16x128xf32>
    %7 = arith.maximumf %5, %6 : vector<16x128xf32>
    %8 = arith.truncf %7 : vector<16x128xf32> to vector<16x128xbf16>
    %c0_6 = arith.constant 0 : index
    %c0_7 = arith.constant 0 : index
    %9 = vector.load %arg4[%c0_6, %c0_7] : memref<128x128xbf16, #tpu.memory_space<vmem>>, vector<128x128xbf16>
    %cst_8 = arith.constant dense<0.000000e+00> : vector<16x128xf32>
    %10 = tpu.matmul %8, %9, %cst_8 {dimension_numbers = #tpu.dot_dimension_numbers<[1], [0], [0], [1], [0, 0, 1, 1], [], []>} : vector<16x128xbf16>, vector<128x128xbf16>, vector<16x128xf32> -> vector<16x128xf32>
    %c0_9 = arith.constant 0 : index
    %c0_10 = arith.constant 0 : index
    %11 = vector.load %arg5[%c0_9, %c0_10] : memref<1x128xf32, #tpu.memory_space<vmem>>, vector<1x128xf32>
    %12 = vector.broadcast %11 : vector<1x128xf32> to vector<16x128xf32>
    %13 = arith.addf %10, %12 : vector<16x128xf32>
    %cst_11 = arith.constant 0.000000e+00 : f32
    %14 = vector.broadcast %cst_11 : f32 to vector<16x128xf32>
    %15 = arith.maximumf %13, %14 : vector<16x128xf32>
    %16 = arith.truncf %15 : vector<16x128xf32> to vector<16x128xbf16>
    %c0_12 = arith.constant 0 : index
    %c0_13 = arith.constant 0 : index
    %17 = vector.load %arg6[%c0_12, %c0_13] : memref<128x128xbf16, #tpu.memory_space<vmem>>, vector<128x128xbf16>
    %cst_14 = arith.constant dense<0.000000e+00> : vector<16x128xf32>
    %18 = tpu.matmul %16, %17, %cst_14 {dimension_numbers = #tpu.dot_dimension_numbers<[1], [0], [0], [1], [0, 0, 1, 1], [], []>} : vector<16x128xbf16>, vector<128x128xbf16>, vector<16x128xf32> -> vector<16x128xf32>
    %c0_15 = arith.constant 0 : index
    %c0_16 = arith.constant 0 : index
    %19 = vector.load %arg7[%c0_15, %c0_16] : memref<1x128xf32, #tpu.memory_space<vmem>>, vector<1x128xf32>
    %20 = vector.broadcast %19 : vector<1x128xf32> to vector<16x128xf32>
    %21 = arith.addf %18, %20 : vector<16x128xf32>
    %c0_17 = arith.constant 0 : index
    %c0_18 = arith.constant 0 : index
    %22 = vector.load %arg8[%c0_17, %c0_18] : memref<16x128xf32, #tpu.memory_space<vmem>>, vector<16x128xf32>
    tpu.vector_store %arg8[%c0_17, %c0_18], %21 {strides = array<i32>} : memref<16x128xf32, #tpu.memory_space<vmem>>, vector<16x128xf32>,
    return
  }
  func.func @transform_0(%arg0: i32) -> (i32, i32) {
    %c0_i32 = arith.constant 0 : i32
    %c0_i32_0 = arith.constant 0 : i32
    return %arg0, %c0_i32 : i32, i32
  }
  func.func @transform_1(%arg0: i32) -> (i32, i32) {
    %c0_i32 = arith.constant 0 : i32
    %c0_i32_0 = arith.constant 0 : i32
    %c0_i32_1 = arith.constant 0 : i32
    return %c0_i32, %c0_i32_0 : i32, i32
  }
  func.func @transform_2(%arg0: i32) -> (i32, i32) {
    %c0_i32 = arith.constant 0 : i32
    %c0_i32_0 = arith.constant 0 : i32
    %c0_i32_1 = arith.constant 0 : i32
    return %c0_i32, %c0_i32_0 : i32, i32
  }
  func.func @transform_3(%arg0: i32) -> (i32, i32) {
    %c0_i32 = arith.constant 0 : i32
    %c0_i32_0 = arith.constant 0 : i32
    %c0_i32_1 = arith.constant 0 : i32
    return %c0_i32, %c0_i32_0 : i32, i32
  }
  func.func @transform_4(%arg0: i32) -> (i32, i32) {
    %c0_i32 = arith.constant 0 : i32
    %c0_i32_0 = arith.constant 0 : i32
    %c0_i32_1 = arith.constant 0 : i32
    return %c0_i32, %c0_i32_0 : i32, i32
  }
  func.func @transform_5(%arg0: i32) -> (i32, i32) {
    %c0_i32 = arith.constant 0 : i32
    %c0_i32_0 = arith.constant 0 : i32
    %c0_i32_1 = arith.constant 0 : i32
    return %c0_i32, %c0_i32_0 : i32, i32
  }
  func.func @transform_6(%arg0: i32) -> (i32, i32) {
    %c0_i32 = arith.constant 0 : i32
    %c0_i32_0 = arith.constant 0 : i32
    %c0_i32_1 = arith.constant 0 : i32
    return %c0_i32, %c0_i32_0 : i32, i32
  }
  func.func @transform_7(%arg0: i32) -> (i32, i32) {
    %c0_i32 = arith.constant 0 : i32
    %c0_i32_0 = arith.constant 0 : i32
    return %arg0, %c0_i32 : i32, i32
  }
}

</mosaic_0001>

<bundles_post_ra>
// kernel: lander_forward.1
= control target key start
LH: loop header
LB: loop body
LE: loop exit
PB: predicated region body
PF: predicated region fallthrough
CT: control target
= control target key end

     0   :  { %v525_v0 = vmov 0.0   ;;  %vm526_vm0 = vmmov 0   ;;  %s687_s1 = inlined_call_operand.vmem [shape: bf16[128,128], index: 1, kind: input, shape index: {}]   ;;  %s688_s3 = inlined_call_operand.vmem [shape: bf16[128,128], index: 3, kind: input, shape index: {}]   ;;  %s689_s0 = inlined_call_operand.vmem [shape: bf16[16,128], index: 0, kind: input, shape index: {}]   ;;  %s690_s5 = inlined_call_operand.vmem [shape: bf16[128,128], index: 5, kind: input, shape index: {}]   ;;  %s691_s2 = inlined_call_operand.vmem [shape: f32[1,128], index: 2, kind: input, shape index: {}]   ;;  %s692_s4 = inlined_call_operand.vmem [shape: f32[1,128], index: 4, kind: input, shape index: {}]   ;;  %s693_s6 = inlined_call_operand.vmem [shape: f32[1,128], index: 6, kind: input, shape index: {}]   ;;  %s694_s7 = inlined_call_operand.vmem [shape: f32[16,128], index: 7, kind: output, shape index: {}]  }
   0x1   :  { %438 = vmatprep.subr.bf16.mxu0 %v525_v0  ;;  %v500_v1 = vld [vmem:[%s687_s1] sm:$0xff]   ;;  %454 = vmatprep.mubr.msk.bf16.mxu0 %vm526_vm0, %v525_v0  ;;  %v501_v2 = vld [vmem:[%s687_s1 + $0x8] sm:$0xff]   ;;  %v502_v3 = vld [vmem:[%s687_s1 + $0x10] sm:$0xff]  }
   0x2   :  { %458 = vmatprep.subr.bf16.mxu1 %v525_v0  ;;  %474 = vmatprep.mubr.msk.bf16.mxu1 %vm526_vm0, %v525_v0  ;;  %v509_v4 = vld [vmem:[%s688_s3] sm:$0xff]   ;;  %v503_v5 = vld [vmem:[%s687_s1 + $0x18] sm:$0xff]   ;;  %v510_v6 = vld [vmem:[%s688_s3 + $0x8] sm:$0xff]  }
   0x3   :  { %439 = vmatpush3.bf16.msra.mxu0 %v500_v1  ;;  %459 = vmatpush3.bf16.msra.mxu1 %v509_v4  ;;  %v504_v7 = vld [vmem:[%s687_s1 + $0x20] sm:$0xff]   ;;  %v511_v8 = vld [vmem:[%s688_s3 + $0x10] sm:$0xff]   ;;  %v505_v9 = vld [vmem:[%s687_s1 + $0x28] sm:$0xff]  }
   0x4   :  { %440 = vmatprep.subr.bf16.mxu0 %v525_v0  ;;  %460 = vmatprep.subr.bf16.mxu1 %v525_v0  ;;  %v512_v10 = vld [vmem:[%s688_s3 + $0x18] sm:$0xff]   ;;  %v506_v11 = vld [vmem:[%s687_s1 + $0x30] sm:$0xff]   ;;  %v513_v12 = vld [vmem:[%s688_s3 + $0x20] sm:$0xff]  }
   0x5   :  { %v507_v13 = vld [vmem:[%s687_s1 + $0x38] sm:$0xff]   ;;  %v514_v14 = vld [vmem:[%s688_s3 + $0x28] sm:$0xff]   ;;  %v508_v15 = vld [vmem:[%s689_s0] sm:$0xff]  }
   0x6   :  { %v515_v16 = vld [vmem:[%s688_s3 + $0x30] sm:$0xff]   ;;  %v516_v17 = vld [vmem:[%s688_s3 + $0x38] sm:$0xff]   ;;  %v517_v18 = vld [vmem:[%s690_s5] sm:$0xff]  }
   0x7   :  { %441 = vmatpush3.bf16.msra.mxu0 %v501_v2  ;;  %461 = vmatpush3.bf16.msra.mxu1 %v510_v6  ;;  %v518_v19 = vld [vmem:[%s690_s5 + $0x8] sm:$0xff]   ;;  %v519_v20 = vld [vmem:[%s690_s5 + $0x10] sm:$0xff]   ;;  %v520_v21 = vld [vmem:[%s690_s5 + $0x18] sm:$0xff]  }
   0x8   :  { %442 = vmatprep.subr.bf16.mxu0 %v525_v0  ;;  %462 = vmatprep.subr.bf16.mxu1 %v525_v0  ;;  %v521_v22 = vld [vmem:[%s690_s5 + $0x20] sm:$0xff]   ;;  %v522_v23 = vld [vmem:[%s690_s5 + $0x28] sm:$0xff]   ;;  %v523_v34 = vld [vmem:[%s690_s5 + $0x30] sm:$0xff]  }
   0x9   :  { %v383_v24 = vld [vmem:[%s691_s2] ss:$0 sm:$0xff]  ;;  %v524_v35 = vld [vmem:[%s690_s5 + $0x38] sm:$0xff]  }
   0xa   :  { %v393_v36 = vld [vmem:[%s692_s4] ss:$0 sm:$0xff] }
   0xb   :  { %443 = vmatpush3.bf16.msra.mxu0 %v502_v3  ;;  %463 = vmatpush3.bf16.msra.mxu1 %v511_v8  ;;  %v402_v46 = vld [vmem:[%s693_s6] ss:$0 sm:$0xff] }
   0xc   :  { %444 = vmatprep.subr.bf16.mxu0 %v525_v0  ;;  %464 = vmatprep.subr.bf16.mxu1 %v525_v0 }
   0xf   :  { %445 = vmatpush3.bf16.msra.mxu0 %v503_v5  ;;  %465 = vmatpush3.bf16.msra.mxu1 %v512_v10 }
  0x10   :  { %446 = vmatprep.subr.bf16.mxu0 %v525_v0  ;;  %466 = vmatprep.subr.bf16.mxu1 %v525_v0 }
  0x13   :  { %447 = vmatpush3.bf16.msra.mxu0 %v504_v7  ;;  %467 = vmatpush3.bf16.msra.mxu1 %v513_v12 }
  0x14   :  { %448 = vmatprep.subr.bf16.mxu0 %v525_v0  ;;  %468 = vmatprep.subr.bf16.mxu1 %v525_v0 }
  0x17   :  { %449 = vmatpush3.bf16.msra.mxu0 %v505_v9  ;;  %469 = vmatpush3.bf16.msra.mxu1 %v514_v14 }
  0x18   :  { %450 = vmatprep.subr.bf16.mxu0 %v525_v0  ;;  %470 = vmatprep.subr.bf16.mxu1 %v525_v0 }
  0x1b   :  { %451 = vmatpush3.bf16.msra.mxu0 %v506_v11  ;;  %471 = vmatpush3.bf16.msra.mxu1 %v515_v16 }
  0x1c   :  { %452 = vmatprep.subr.bf16.mxu0 %v525_v0  ;;  %472 = vmatprep.subr.bf16.mxu1 %v525_v0 }
  0x1f   :  { %453 = vmatpush3.bf16.msra.mxu0 %v507_v13  ;;  %473 = vmatpush3.bf16.msra.mxu1 %v516_v17 }
  0x20   :  { %478 = vmatprep.subr.bf16.mxu0 %v525_v0 }
  0x22   :  { %455 = vmatmul.mubr.bf16.vlgmr.msra.gmra.mrb[0].mxu0 %v508_v15 }
  0x23   :  { %494 = vmatprep.mubr.msk.bf16.mxu0 %vm526_vm0, %v525_v0  ;;  %479 = vmatpush3.bf16.msra.mxu0 %v517_v18 }
  0x24   :  { %480 = vmatprep.subr.bf16.mxu0 %v525_v0 }
  0x27   :  { %481 = vmatpush3.bf16.msra.mxu0 %v518_v19 }
  0x28   :  { %482 = vmatprep.subr.bf16.mxu0 %v525_v0 }
  0x2b   :  { %483 = vmatpush3.bf16.msra.mxu0 %v519_v20 }
  0x2c   :  { %484 = vmatprep.subr.bf16.mxu0 %v525_v0 }
  0x2f   :  { %485 = vmatpush3.bf16.msra.mxu0 %v520_v21 }
  0x30   :  { %486 = vmatprep.subr.bf16.mxu0 %v525_v0 }
  0x33   :  { %487 = vmatpush3.bf16.msra.mxu0 %v521_v22 }
  0x34   :  { %488 = vmatprep.subr.bf16.mxu0 %v525_v0 }
  0x37   :  { %489 = vmatpush3.bf16.msra.mxu0 %v522_v23 }
  0x38   :  { %490 = vmatprep.subr.bf16.mxu0 %v525_v0 }
  0x3b   :  { %491 = vmatpush3.bf16.msra.mxu0 %v523_v34 }
  0x3c   :  { %492 = vmatprep.subr.bf16.mxu0 %v525_v0 }
  0x3f   :  { %493 = vmatpush3.bf16.msra.mxu0 %v524_v35 }
  0xf5   :  { %v140_v25 = vpop.f32.mrb[0].mxu0 }
  0xf6   :  { %v141_v26 = vadd.f32 %v383_v24, %v140_v25  ;;  %v456_v27 = vpop.f32.mrb[1].mxu0 }
  0xf7   :  { %v143_v28 = vpop.f32.mrb[2].mxu0 }
  0xf8   :  { %v144_v29 = vadd.f32 %v383_v24, %v143_v28  ;;  %v457_v30 = vpop.f32.mrb[3].mxu0  ;;  %v147_v31 = vmax.f32 %v141_v26, 0.0 }
  0xfa   :  { %v148_v32 = vmax.f32 %v144_v29, 0.0 }
  0xfc   :  { %v149_v33 = vpack.c.bf16 %v148_v32, %v147_v31 }
  0xfe   :  { %475 = vmatmul.mubr.bf16.vlgmr.msra.gmra.mrb[0].mxu1 %v149_v33 }
 0x1d1   :  { %v255_v37 = vpop.f32.mrb[0].mxu1 }
 0x1d2   :  { %v256_v38 = vadd.f32 %v393_v36, %v255_v37  ;;  %v476_v39 = vpop.f32.mrb[1].mxu1 }
 0x1d3   :  { %v258_v40 = vpop.f32.mrb[2].mxu1 }
 0x1d4   :  { %v259_v41 = vadd.f32 %v393_v36, %v258_v40  ;;  %v477_v42 = vpop.f32.mrb[3].mxu1  ;;  %v262_v43 = vmax.f32 %v256_v38, 0.0 }
 0x1d6   :  { %v263_v44 = vmax.f32 %v259_v41, 0.0 }
 0x1d8   :  { %v264_v45 = vpack.c.bf16 %v263_v44, %v262_v43 }
 0x1da   :  { %495 = vmatmul.mubr.bf16.vlgmr.msra.gmra.mrb[4].mxu0 %v264_v45 }
 0x2ad   :  { %v370_v47 = vpop.f32.mrb[4].mxu0 }
 0x2ae   :  { %v371_v48 = vadd.f32 %v402_v46, %v370_v47  ;;  %v496_v49 = vpop.f32.mrb[5].mxu0 }
 0x2af   :  { %v373_v50 = vpop.f32.mrb[6].mxu0 }
 0x2b0   :  { %377 = vst [vmem:[%s694_s7] sm:$0xff] %v371_v48  ;;  %v374_v51 = vadd.f32 %v402_v46, %v373_v50  ;;  %v497_v52 = vpop.f32.mrb[7].mxu0 }
 0x2b2   :  { %378 = vst [vmem:[%s694_s7 + $0x8] sm:$0xff] %v374_v51 }

</bundles_post_ra>
